<compile_context>
chip_gen: v7x
topology: tpu7x:2x2x1
jax: 0.10.0
libtpu: 0.0.40
codegen_flags: <defaults>
</compile_context>

<pallas_src>
import jax
import jax.numpy as jnp
from jax.experimental import pallas as pl
from jax.experimental.pallas import tpu as pltpu

OUT_ROWS = 16   # 11 real output rows padded up to a multiple of 8 sublanes


def _round_up(n, m):
    return (n + m - 1) // m * m


def qualitynet_kernel(x_ref, w1_ref, w2_ref, w3_ref, bias_ref, o_ref):
    x = x_ref[...]                        # (2, TB)  f32, batch on the lane axis
    b = bias_ref[...]                     # (88, 1)  packed [b1; b2; b3 (padded)]
    b1 = b[0:24, :]                       # (24, 1)
    b2 = b[24:72, :]                      # (48, 1)
    b3 = b[72:88, :]                      # (16, 1), rows 11..15 are zero

    # fc1 + ReLU on the VPU: K=2 would waste an MXU pass -> two broadcast FMAs.
    w1 = w1_ref[...]                      # (24, 2) = W1^T
    h1 = w1[:, 0:1] * x[0:1, :] + w1[:, 1:2] * x[1:2, :] + b1
    h1 = jnp.maximum(h1, 0.0)             # (24, TB)

    # fc2 + ReLU (MXU, f32 accumulation)
    h2 = jnp.dot(w2_ref[...], h1, preferred_element_type=jnp.float32) + b2
    h2 = jnp.maximum(h2, 0.0)             # (48, TB)

    # fc3 (11 rows padded to 16 sublanes -> dense, lane-major store)
    out = jnp.dot(w3_ref[...], h2, preferred_element_type=jnp.float32) + b3
    o_ref[...] = out.astype(o_ref.dtype)  # (16, TB)


def qualitynet_forward(x, params, *, tb=8192):
    """x: (B, 2) f32 -> (B, 11) f32."""
    w1, b1, w2, b2, w3, b3 = params
    B = x.shape[0]
    if B == 0:                            # guard: empty batch (avoids div-by-zero)
        return jnp.zeros((0, 11), jnp.float32)

    # Transposed weights (left multiplication): out_col = W^T @ x_col + b.
    w1t = jnp.asarray(w1, jnp.float32).T                              # (24, 2)
    w2t = jnp.asarray(w2, jnp.float32).T                              # (48, 24)
    w3t = jnp.zeros((OUT_ROWS, 48), jnp.float32).at[:11, :].set(
        jnp.asarray(w3, jnp.float32).T)                               # (16, 48)
    bias = jnp.zeros((88, 1), jnp.float32)
    bias = bias.at[0:24, 0].set(b1.reshape(-1))
    bias = bias.at[24:72, 0].set(b2.reshape(-1))
    bias = bias.at[72:83, 0].set(b3.reshape(-1))

    # Batch on the lane axis: pad only up to a multiple of 128 lanes.
    B_pad = _round_up(B, 128)
    xt = jnp.zeros((2, B_pad), jnp.float32).at[:, :B].set(x.T)

    # Lane tile: large (amortizes ~0.35us/step), but capped near ceil(B/2) so the
    # grid has >=2 steps whenever possible (v7x: both TensorCores get work).
    TB = min(_round_up(tb, 128), _round_up(pl.cdiv(B_pad, 2), 128))
    grid = (pl.cdiv(B_pad, TB),)

    resident = lambda shape: pl.BlockSpec(shape, lambda i: (0,) * len(shape))

    out = pl.pallas_call(
        qualitynet_kernel,
        out_shape=jax.ShapeDtypeStruct((OUT_ROWS, B_pad), jnp.float32),
        grid=grid,
        in_specs=[
            pl.BlockSpec((2, TB), lambda i: (0, i)),   # x: tiled over lanes (batch)
            resident((24, 2)),                         # W1^T, resident in VMEM
            resident((48, 24)),                        # W2^T
            resident((OUT_ROWS, 48)),                  # W3^T padded to 16 rows
            resident((88, 1)),                         # packed biases
        ],
        out_specs=pl.BlockSpec((OUT_ROWS, TB), lambda i: (0, i)),
        compiler_params=pltpu.CompilerParams(
            dimension_semantics=("parallel",),         # batch axis -> both TCs on v7x
        ),
    )(xt, w1t, w2t, w3t, bias)

    # Back to the module's (B, 11) row-major interface.
    return out[:11, :B].T


def init_params(key):
    """Deterministic init mimicking torch.nn.Linear (uniform +-1/sqrt(fan_in))."""
    dims = [(2, 24), (24, 48), (48, 11)]
    params = []
    for i, (fan_in, fan_out) in enumerate(dims):
        kw, kb = jax.random.split(jax.random.fold_in(key, i))
        bound = 1.0 / jnp.sqrt(float(fan_in))
        w = jax.random.uniform(kw, (fan_in, fan_out), jnp.float32, -bound, bound)
        b = jax.random.uniform(kb, (1, fan_out), jnp.float32, -bound, bound)
        params += [w, b]
    return tuple(params)


def reference_forward(x, params):
    w1, b1, w2, b2, w3, b3 = params
    h1 = jnp.maximum(x @ w1 + b1, 0.0)
    h2 = jnp.maximum(h1 @ w2 + b2, 0.0)
    return h2 @ w3 + b3


if __name__ == "__main__":
    key = jax.random.PRNGKey(0)
    params = init_params(key)

    # Small batch (not a multiple of 128) -> exercises lane padding, single grid step.
    B = 100
    x = jax.random.normal(jax.random.fold_in(key, 100), (B, 2), jnp.float32)
    ref = reference_forward(x, params)
    out = jax.block_until_ready(qualitynet_forward(x, params))
    assert out.shape == (B, 11), out.shape
    assert jnp.allclose(out, ref, atol=1e-5, rtol=1e-5), "mismatch vs reference (B=100)"

    # Larger batch with a small tile -> multi-step grid + partial last block.
    B2 = 300
    x2 = jax.random.normal(jax.random.fold_in(key, 200), (B2, 2), jnp.float32)
    ref2 = reference_forward(x2, params)
    out2 = jax.block_until_ready(qualitynet_forward(x2, params, tb=256))
    assert out2.shape == (B2, 11), out2.shape
    assert jnp.allclose(out2, ref2, atol=1e-5, rtol=1e-5), "mismatch vs reference (B=300)"

    print("KERNEL_OK")
</pallas_src>

<mosaic_0001>
module attributes {stable_mosaic.version = 11 : i64} {
  func.func @qualitynet_kernel(%arg0: i32, %arg1: memref<2x128xf32, #tpu.memory_space<vmem>>, %arg2: memref<24x2xf32, #tpu.memory_space<vmem>>, %arg3: memref<48x24xf32, #tpu.memory_space<vmem>>, %arg4: memref<16x48xf32, #tpu.memory_space<vmem>>, %arg5: memref<88x1xf32, #tpu.memory_space<vmem>>, %arg6: memref<16x128xf32, #tpu.memory_space<vmem>>) attributes {dimension_semantics = [#tpu.dimension_semantics<parallel>], iteration_bounds = array<i64: 1>, scalar_prefetch = 0 : i64, scratch_operands = 0 : i64, tpu.core_type = #tpu.core_type<tc>, window_params = [{transform_indices = @transform_0, window_bounds = array<i64: 2, 128>}, {pipeline_mode = #tpu.pipeline_mode<synchronous>, transform_indices = @transform_1, window_bounds = array<i64: 24, 2>}, {pipeline_mode = #tpu.pipeline_mode<synchronous>, transform_indices = @transform_2, window_bounds = array<i64: 48, 24>}, {pipeline_mode = #tpu.pipeline_mode<synchronous>, transform_indices = @transform_3, window_bounds = array<i64: 16, 48>}, {pipeline_mode = #tpu.pipeline_mode<synchronous>, transform_indices = @transform_4, window_bounds = array<i64: 88, 1>}, {transform_indices = @transform_5, window_bounds = array<i64: 16, 128>}]} {
    %c0 = arith.constant 0 : index
    %c0_0 = arith.constant 0 : index
    %0 = vector.load %arg1[%c0, %c0_0] : memref<2x128xf32, #tpu.memory_space<vmem>>, vector<2x128xf32>
    %c0_1 = arith.constant 0 : index
    %c0_2 = arith.constant 0 : index
    %1 = vector.load %arg5[%c0_1, %c0_2] : memref<88x1xf32, #tpu.memory_space<vmem>>, vector<88x1xf32>
    %2 = vector.extract_strided_slice %1 {offsets = [0, 0], sizes = [24, 1], strides = [1, 1]} : vector<88x1xf32> to vector<24x1xf32>
    %3 = vector.extract_strided_slice %1 {offsets = [24, 0], sizes = [48, 1], strides = [1, 1]} : vector<88x1xf32> to vector<48x1xf32>
    %4 = vector.extract_strided_slice %1 {offsets = [72, 0], sizes = [16, 1], strides = [1, 1]} : vector<88x1xf32> to vector<16x1xf32>
    %c0_3 = arith.constant 0 : index
    %c0_4 = arith.constant 0 : index
    %5 = vector.load %arg2[%c0_3, %c0_4] : memref<24x2xf32, #tpu.memory_space<vmem>>, vector<24x2xf32>
    %6 = vector.extract_strided_slice %5 {offsets = [0, 0], sizes = [24, 1], strides = [1, 1]} : vector<24x2xf32> to vector<24x1xf32>
    %7 = vector.extract_strided_slice %0 {offsets = [0, 0], sizes = [1, 128], strides = [1, 1]} : vector<2x128xf32> to vector<1x128xf32>
    %8 = vector.broadcast %6 : vector<24x1xf32> to vector<24x128xf32>
    %9 = vector.broadcast %7 : vector<1x128xf32> to vector<24x128xf32>
    %10 = arith.mulf %8, %9 : vector<24x128xf32>
    %11 = vector.extract_strided_slice %5 {offsets = [0, 1], sizes = [24, 1], strides = [1, 1]} : vector<24x2xf32> to vector<24x1xf32>
    %12 = vector.extract_strided_slice %0 {offsets = [1, 0], sizes = [1, 128], strides = [1, 1]} : vector<2x128xf32> to vector<1x128xf32>
    %13 = vector.broadcast %11 : vector<24x1xf32> to vector<24x128xf32>
    %14 = vector.broadcast %12 : vector<1x128xf32> to vector<24x128xf32>
    %15 = arith.mulf %13, %14 : vector<24x128xf32>
    %16 = arith.addf %10, %15 : vector<24x128xf32>
    %17 = vector.broadcast %2 : vector<24x1xf32> to vector<24x128xf32>
    %18 = arith.addf %16, %17 : vector<24x128xf32>
    %cst = arith.constant 0.000000e+00 : f32
    %19 = vector.broadcast %cst : f32 to vector<24x128xf32>
    %20 = arith.maximumf %18, %19 : vector<24x128xf32>
    %c0_5 = arith.constant 0 : index
    %c0_6 = arith.constant 0 : index
    %21 = vector.load %arg3[%c0_5, %c0_6] : memref<48x24xf32, #tpu.memory_space<vmem>>, vector<48x24xf32>
    %cst_7 = arith.constant dense<0.000000e+00> : vector<48x128xf32>
    %22 = tpu.matmul %21, %20, %cst_7 {dimension_numbers = #tpu.dot_dimension_numbers<[1], [0], [0], [1], [0, 0, 1, 1], [], []>} : vector<48x24xf32>, vector<24x128xf32>, vector<48x128xf32> -> vector<48x128xf32>
    %23 = vector.broadcast %3 : vector<48x1xf32> to vector<48x128xf32>
    %24 = arith.addf %22, %23 : vector<48x128xf32>
    %cst_8 = arith.constant 0.000000e+00 : f32
    %25 = vector.broadcast %cst_8 : f32 to vector<48x128xf32>
    %26 = arith.maximumf %24, %25 : vector<48x128xf32>
    %c0_9 = arith.constant 0 : index
    %c0_10 = arith.constant 0 : index
    %27 = vector.load %arg4[%c0_9, %c0_10] : memref<16x48xf32, #tpu.memory_space<vmem>>, vector<16x48xf32>
    %cst_11 = arith.constant dense<0.000000e+00> : vector<16x128xf32>
    %28 = tpu.matmul %27, %26, %cst_11 {dimension_numbers = #tpu.dot_dimension_numbers<[1], [0], [0], [1], [0, 0, 1, 1], [], []>} : vector<16x48xf32>, vector<48x128xf32>, vector<16x128xf32> -> vector<16x128xf32>
    %29 = vector.broadcast %4 : vector<16x1xf32> to vector<16x128xf32>
    %30 = arith.addf %28, %29 : vector<16x128xf32>
    %c0_12 = arith.constant 0 : index
    %c0_13 = arith.constant 0 : index
    %31 = vector.load %arg6[%c0_12, %c0_13] : memref<16x128xf32, #tpu.memory_space<vmem>>, vector<16x128xf32>
    tpu.vector_store %arg6[%c0_12, %c0_13], %30 {strides = array<i32>} : memref<16x128xf32, #tpu.memory_space<vmem>>, vector<16x128xf32>,
    return
  }
  func.func @transform_0(%arg0: i32) -> (i32, i32) {
    %c0_i32 = arith.constant 0 : i32
    %c0_i32_0 = arith.constant 0 : i32
    return %c0_i32, %arg0 : i32, i32
  }
  func.func @transform_1(%arg0: i32) -> (i32, i32) {
    %c0_i32 = arith.constant 0 : i32
    %c0_i32_0 = arith.constant 0 : i32
    %c0_i32_1 = arith.constant 0 : i32
    return %c0_i32, %c0_i32_0 : i32, i32
  }
  func.func @transform_2(%arg0: i32) -> (i32, i32) {
    %c0_i32 = arith.constant 0 : i32
    %c0_i32_0 = arith.constant 0 : i32
    %c0_i32_1 = arith.constant 0 : i32
    return %c0_i32, %c0_i32_0 : i32, i32
  }
  func.func @transform_3(%arg0: i32) -> (i32, i32) {
    %c0_i32 = arith.constant 0 : i32
    %c0_i32_0 = arith.constant 0 : i32
    %c0_i32_1 = arith.constant 0 : i32
    return %c0_i32, %c0_i32_0 : i32, i32
  }
  func.func @transform_4(%arg0: i32) -> (i32, i32) {
    %c0_i32 = arith.constant 0 : i32
    %c0_i32_0 = arith.constant 0 : i32
    %c0_i32_1 = arith.constant 0 : i32
    return %c0_i32, %c0_i32_0 : i32, i32
  }
  func.func @transform_5(%arg0: i32) -> (i32, i32) {
    %c0_i32 = arith.constant 0 : i32
    %c0_i32_0 = arith.constant 0 : i32
    return %c0_i32, %arg0 : i32, i32
  }
}

</mosaic_0001>

<bundles_post_ra>
// kernel: tpu_custom_call.1
= control target key start
LH: loop header
LB: loop body
LE: loop exit
PB: predicated region body
PF: predicated region fallthrough
CT: control target
= control target key end

     0   :  { %v474_v1 = vmov 1   ;;  %v475_v2 = vmov 0   ;;  %s598_s0 = inlined_call_operand.vmem [shape: f32[2,128], index: 0, kind: input, shape index: {}]   ;;  %s599_s1 = inlined_call_operand.vmem [shape: f32[24,2], index: 1, kind: input, shape index: {}]   ;;  %s600_s2 = inlined_call_operand.vmem [shape: f32[48,24], index: 2, kind: input, shape index: {}]   ;;  %s601_s3 = inlined_call_operand.vmem [shape: f32[16,48], index: 3, kind: input, shape index: {}]   ;;  %s602_s4 = inlined_call_operand.vmem [shape: f32[88,1], index: 4, kind: input, shape index: {}]   ;;  %s603_s5 = inlined_call_operand.hbm [shape: f32[16,128], index: 5, kind: output, shape index: {}]  }
   0x1   :  { %v33_v0 = vld [vmem:[%s599_s1] sm:$0xff]  ;;  %446 = vset.pattern.permute.xlu1 %v474_v1  ;;  %445 = vset.pattern.permute.xlu0 %v475_v2  ;;  %v34_v3 = vld [vmem:[%s599_s1 + $0x8] sm:$0xff] }
   0x2   :  { %59 = vperm.xlu1 %446, %v33_v0   ;;  %38 = vperm.xlu0 %445, %v33_v0  }
   0x3   :  { %10 = vsyncpa [#allocation3], 0  ;;  %v22_v4 = vld [vmem:[%s602_s4] sm:$0xff]  ;;  %v23_v5 = vld [vmem:[%s602_s4 + $0x8] sm:$0xff]  ;;  %vm137_vm0 = vcmask 195584   ;;  %v51_v17 = vlaneseq  ;;  %vm269_vm1 = vcmask 392192  }
   0x4   :  { %v35_v6 = vld [vmem:[%s599_s1 + $0x10] sm:$0xff]  ;;  %v26_v8 = vld [vmem:[%s602_s4 + $0x20] sm:$0xff]  ;;  %v25_v13 = vld [vmem:[%s602_s4 + $0x18] sm:$0xff]  ;;  %s476_s1 = smov [#allocation2]  }
   0x5   :  { %v24_v7 = vld [vmem:[%s602_s4 + $0x10] sm:$0xff]  ;;  %v101_v10 = vld [vmem:[%s600_s2] sm:$0xff]  ;;  %v27_v14 = vld [vmem:[%s602_s4 + $0x28] sm:$0xff]  ;;  %v52_v18 = vshrl.u32 %v51_v17, 7  ;;  %s358_s10 = sshll.u32 %s476_s1, 4  ;;  %s359_s10 = int_to_ptr.vmem [resolvable:$true] %s358_s10 }
   0x6   :  { %63 = vperm.xlu1 %446, %v34_v3   ;;  %43 = vperm.xlu0 %445, %v34_v3   ;;  %v28_v9 = vld [vmem:[%s602_s4 + $0x30] sm:$0xff]  ;;  %v30_v11 = vld [vmem:[%s602_s4 + $0x40] sm:$0xff]  ;;  %v29_v15 = vld [vmem:[%s602_s4 + $0x38] sm:$0xff]  ;;  %s450_s11 = scalar_lea.vmem %s359_s10, 256  ;;  %p455_p1 = scmp.lt.s32.totalorder %s359_s10, %s359_s10 }
   0x7   :  { %400 = vmatprep.mubr.msk.f32.mxu0 %vm137_vm0, %v101_v10  ;;  %v32_v12 = vld [vmem:[%s602_s4 + $0x50] sm:$0xff]  ;;  %v31_v16 = vld [vmem:[%s602_s4 + $0x48] sm:$0xff]  ;;  %v72_v19 = vsub.s32 1, %v52_v18  ;;  %v53_v20 = vsub.s32 0, %v52_v18  ;;  %v21_v21 = vld [vmem:[%s598_s0] sm:$0x3]  ;;  %p451_p0 = scmp.ne.s32.totalorder %s359_s10, %s450_s11  ;;  %p456_p2 = scmp.lt.s32.totalorder %s450_s11, %s450_s11 }
   0x8   :  { %v102_v49 = vld [vmem:[%s600_s2 + $0x8] sm:$0xff]  ;;  %v103_v50 = vld [vmem:[%s600_s2 + $0x10] sm:$0xff]  ;;  %v104_v51 = vld [vmem:[%s600_s2 + $0x18] sm:$0xff] }
   0x9   :  { %v73_v22 = vrot.slane %v21_v21, %v72_v19  ;;  %v54_v23 = vrot.slane %v21_v21, %v53_v20  ;;  %v105_v52 = vld [vmem:[%s600_s2 + $0x20] sm:$0xff]  ;;  %v106_v53 = vld [vmem:[%s600_s2 + $0x28] sm:$0xff]  ;;  %p457_p3 = por %p456_p2, %p455_p1 }
   0xa   :  { %447 = vset.pattern.permute.xlu1 %v475_v2  ;;  %82 = vperm.xlu0 %445, %v22_v4   ;;  %v257_v54 = vld [vmem:[%s601_s3] sm:$0xff]  ;;  %v258_v18 = vld [vmem:[%s601_s3 + $0x8] sm:$0xff] }
   0xb   :  { %87 = vperm.xlu1 %447, %v23_v5   ;;  %421 = vmatprep.mubr.msk.f32.mxu1 %vm269_vm1, %v257_v54  ;;  %p458_p4 = pnand %p457_p3, %p451_p0 }
   0xe   :  { %48 = vperm.xlu0 %445, %v35_v6  }
   0xf   :  { %448 = vset.pattern.permute.xlu1 %v474_v1 }
  0x10   :  { %67 = vperm.xlu1 %448, %v35_v6  }
  0x12   :  { %92 = vperm.xlu0 %445, %v24_v7  }
  0x14   :  { %449 = vset.pattern.permute.xlu1 %v475_v2 }
  0x15   :  { %109 = vperm.xlu1 %449, %v25_v13  }
  0x16   :  { %114 = vperm.xlu0 %445, %v26_v8  }
  0x19   :  { %119 = vperm.xlu1 %449, %v27_v14  }
  0x1a   :  { %124 = vperm.xlu0 %445, %v28_v9  }
  0x1d   :  { %129 = vperm.xlu1 %449, %v29_v15  }
  0x1e   :  { %134 = vperm.xlu0 %445, %v30_v11  }
  0x21   :  { %261 = vperm.xlu1 %449, %v31_v16  }
  0x22   :  { %266 = vperm.xlu0 %445, %v32_v12  }
  0x81   :  { %v60_v24 = vpop.permute.xlu1 %59  ;;  %v39_v25 = vpop.permute.xlu0 %38 }
  0x82   :  { %v74_v26 = vmul.f32 %v73_v22, %v60_v24  ;;  %v55_v27 = vmul.f32 %v54_v23, %v39_v25 }
  0x84   :  { %v77_v32 = vadd.f32 %v74_v26, %v55_v27 }
  0x85   :  { %v64_v28 = vpop.permute.xlu1 %63  ;;  %v44_v29 = vpop.permute.xlu0 %43 }
  0x86   :  { %v75_v30 = vmul.f32 %v73_v22, %v64_v28  ;;  %v56_v31 = vmul.f32 %v54_v23, %v44_v29 }
  0x88   :  { %v78_v33 = vadd.f32 %v75_v30, %v56_v31 }
  0x89   :  { %v83_v34 = vpop.permute.xlu0 %82 }
  0x8a   :  { %v95_v35 = vadd.f32 %v83_v34, %v77_v32  ;;  %v88_v36 = vpop.permute.xlu1 %87 }
  0x8b   :  { %v96_v37 = vadd.f32 %v88_v36, %v78_v33 }
  0x8c   :  { %v98_v38 = vmax.f32 %v95_v35, 0.0 }
  0x8d   :  { %v99_v39 = vmax.f32 %v96_v37, 0.0  ;;  %v49_v40 = vpop.permute.xlu0 %48 }
  0x8e   :  { %v57_v43 = vmul.f32 %v54_v23, %v49_v40 }
  0x8f   :  { %v68_v41 = vpop.permute.xlu1 %67  ;;  %v424_v42 = vpack.c.bf16 %v99_v39, %v98_v38 }
  0x90   :  { %v76_v44 = vmul.f32 %v73_v22, %v68_v41 }
  0x91   :  { %425 = vmatprep.subr.bf16.mxu0 %v424_v42  ;;  %v93_v46 = vpop.permute.xlu0 %92 }
  0x92   :  { %v79_v45 = vadd.f32 %v76_v44, %v57_v43  ;;  %427 = vmatpush3.bf16.msra.mxu0 %v424_v42 }
  0x94   :  { %v97_v47 = vadd.f32 %v93_v46, %v79_v45  ;;  %v110_v56 = vpop.permute.xlu1 %109 }
  0x95   :  { %v115_v55 = vpop.permute.xlu0 %114 }
  0x96   :  { %v100_v48 = vmax.f32 %v97_v47, 0.0 }
  0x98   :  { %398 = vmatprep.subr.mxu0 %v100_v48  ;;  %v120_v62 = vpop.permute.xlu1 %119 }
  0x99   :  { %399 = vmatpush3.msra.mxu0 %v100_v48  ;;  %v125_v60 = vpop.permute.xlu0 %124 }
  0x9a   :  { %401 = vmatmul.mubr.msk.f32.vlgmr.msra.gmra.mrb[0].mxu0 %vm137_vm0, %v102_v49 }
  0x9b   :  { %403 = vmatprep.mubr.msk.f32.mxu0 %vm137_vm0, %v103_v50 }
  0x9c   :  { %v130_v10 = vpop.permute.xlu1 %129 }
  0x9d   :  { %v135_v7 = vpop.permute.xlu0 %134 }
  0x9e   :  { %404 = vmatmul.mubr.msk.f32.gmra.mrb[2].mxu0 %vm137_vm0, %v104_v51 }
  0x9f   :  { %406 = vmatprep.mubr.msk.f32.mxu0 %vm137_vm0, %v105_v52 }
  0xa0   :  { %v262_v21 = vpop.permute.xlu1 %261 }
  0xa1   :  { %v267_v19 = vpop.permute.xlu0 %266 }
  0xa2   :  { %407 = vmatmul.mubr.msk.f32.gmra.mrb[4].mxu0 %vm137_vm0, %v106_v53 }
 0x16d   :  { %v402_v57 = vpop.f32.mrb[0].mxu0 }
 0x16e   :  { %v228_v58 = vadd.f32 %v402_v57, %v115_v55  ;;  %v222_v59 = vpop.f32.mrb[1].mxu0 }
 0x16f   :  { %v223_v61 = vadd.f32 %v222_v59, %v110_v56 }
 0x170   :  { %v252_v63 = vmax.f32 %v228_v58, 0.0 }
 0x171   :  { %v251_v0 = vmax.f32 %v223_v61, 0.0  ;;  %v405_v1 = vpop.f32.mrb[2].mxu0 }
 0x172   :  { %v238_v2 = vadd.f32 %v405_v1, %v125_v60  ;;  %v232_v3 = vpop.f32.mrb[3].mxu0 }
 0x173   :  { %v233_v4 = vadd.f32 %v232_v3, %v120_v62  ;;  %v428_v5 = vpack.c.bf16 %v252_v63, %v251_v0 }
 0x174   :  { %v254_v6 = vmax.f32 %v238_v2, 0.0 }
 0x175   :  { %v253_v8 = vmax.f32 %v233_v4, 0.0  ;;  %v408_v9 = vpop.f32.mrb[4].mxu0  ;;  %429 = vmatprep.subr.bf16.mxu1 %v428_v5 }
 0x176   :  { %v248_v11 = vadd.f32 %v408_v9, %v135_v7  ;;  %v242_v12 = vpop.f32.mrb[5].mxu0  ;;  %431 = vmatpush3.bf16.msra.mxu1 %v428_v5 }
 0x177   :  { %v432_v13 = vpack.c.bf16 %v254_v6, %v253_v8  ;;  %v243_v14 = vadd.f32 %v242_v12, %v130_v10 }
 0x178   :  { %v256_v15 = vmax.f32 %v248_v11, 0.0 }
 0x179   :  { %v255_v16 = vmax.f32 %v243_v14, 0.0  ;;  %433 = vmatprep.subr.bf16.mxu1 %v432_v13 }
 0x17a   :  { %435 = vmatpush3.bf16.msra.mxu1 %v432_v13 }
 0x17b   :  { %v436_v17 = vpack.c.bf16 %v256_v15, %v255_v16 }
 0x17d   :  { %437 = vmatprep.subr.bf16.mxu1 %v436_v17 }
 0x17e   :  { %439 = vmatpush3.bf16.msra.mxu1 %v436_v17 }
 0x181   :  { %422 = vmatmul.mubr.msk.f32.vlgmr.msra.gmra.mrb[0].mxu1 %vm269_vm1, %v258_v18 }
 0x254   :  { %v423_v20 = vpop.f32.mrb[0].mxu1 }
 0x255   :  { %v348_v22 = vadd.f32 %v423_v20, %v267_v19  ;;  %v342_v23 = vpop.f32.mrb[1].mxu1 }
 0x256   :  { %v343_v24 = vadd.f32 %v342_v23, %v262_v21 }
 0x257   :  { %352 = vst [vmem:[#allocation2 + $0x8] sm:$0xff] %v348_v22 }
 0x258   :  { %351 = vst [vmem:[#allocation2] sm:$0xff] %v343_v24 }
 0x259   :  { %461 = shalt.err (!%p458_p4)
}
 0x25a   :  { %s462_s13 = scalar_lea.hbm %s603_s5, 256 }
 0x25b   :  { %p463_p5 = scmp.ne.s32.totalorder %s603_s5, %s462_s13  ;;  %p466_p6 = scmp.lt.u32.totalorder %s462_s13, %s603_s5 }
 0x25d   :  { %p468_p7 = pnand %p466_p6, %p463_p5 }
 0x25f   :  { %471 = shalt.err (!%p468_p7)
}
 0x260   :  { %s477_s18 = smov 128   ;;  %s478_s19 = smov 8  }
 0x261   :  { %364 = dma.vmem_to_hbm [thread:$0]  %s359_s10, 256, %s603_s5, [#allocation3], %s477_s18, %s477_s18, %s478_s19  }
 0x262   :  { %472 = dma.done.wait [#allocation3], 256  }
 0x263   :  { %473 = vsyncadd [#allocation3], 4294967040 }
 0x264   :  { %368 = vsyncpa [#allocation3], 1 }

</bundles_post_ra>
